<compile_context>
chip_gen: v6e
topology: v6e:2x2x1
jax: 0.10.0
libtpu: 0.0.40
codegen_flags: <defaults>
</compile_context>

<pallas_src>
import functools
import math

import jax
import jax.numpy as jnp
from jax.experimental import pallas as pl
from jax.experimental.pallas import tpu as pltpu


def gpt_block_kernel(x_ref, wqkv_ref, wo_ref,
                     g1_ref, be1_ref, w1_ref, b1_ref, w2_ref, b2_ref,
                     g2_ref, be2_ref, o_ref, *, num_heads, head_dim):
    H, hd = num_heads, head_dim
    HD = H * hd
    x = x_ref[...]                                  # (T, D) f32: this batch's rows
    T, D = x.shape
    scale = 1.0 / math.sqrt(hd)

    # ---- fused QKV projection: one wide bf16 matmul, N = 3*H*hd lanes ----
    qkv = jnp.dot(x.astype(jnp.bfloat16), wqkv_ref[...],
                  preferred_element_type=jnp.float32)            # (T, 3*H*hd) f32

    # causal mask from dec_valid_lens = arange(1, T+1): key j valid iff j <= i
    row = jax.lax.broadcasted_iota(jnp.int32, (T, T), 0)
    col = jax.lax.broadcasted_iota(jnp.int32, (T, T), 1)
    causal = col <= row

    # ---- per-head scaled dot-product attention (static lane slices of qkv) ----
    head_outs = []
    for h in range(H):                              # H small & static -> unrolled
        qh = qkv[:, h * hd:(h + 1) * hd].astype(jnp.bfloat16)
        kh = qkv[:, HD + h * hd:HD + (h + 1) * hd].astype(jnp.bfloat16)
        vh = qkv[:, 2 * HD + h * hd:2 * HD + (h + 1) * hd].astype(jnp.bfloat16)
        # q @ k^T (contraction on the hd axis of both; no materialized transpose)
        s = jax.lax.dot_general(qh, kh, (((1,), (1,)), ((), ())),
                                preferred_element_type=jnp.float32) * scale
        s = jnp.where(causal, s, -1000000.0)        # sequence_mask fill value
        p = jnp.exp(s - jnp.max(s, axis=-1, keepdims=True))
        p = p * pl.reciprocal(jnp.sum(p, axis=-1, keepdims=True), approx=True)  # EUP slot
        head_outs.append(jnp.dot(p.astype(jnp.bfloat16), vh,
                                 preferred_element_type=jnp.float32))            # (T, hd)

    # ---- concat heads + single output projection with unreplicated W_o ----
    attn2d = jnp.concatenate(head_outs, axis=-1)    # (T, H*hd) == transpose_output concat
    x2 = jnp.dot(attn2d.astype(jnp.bfloat16), wo_ref[...],
                 preferred_element_type=jnp.float32)             # (T, D)

    def layer_norm(z, gamma, beta):
        mu = jnp.mean(z, axis=-1, keepdims=True)
        var = jnp.maximum(jnp.mean(z * z, axis=-1, keepdims=True) - mu * mu, 0.0)
        return (z - mu) * jax.lax.rsqrt(var + 1e-5) * gamma + beta

    # ---- AddNorm 1 ----
    y = layer_norm(x + x2, g1_ref[...], be1_ref[...])

    # ---- PositionWiseFFN ----
    h1 = jnp.dot(y.astype(jnp.bfloat16), w1_ref[...],
                 preferred_element_type=jnp.float32) + b1_ref[...]
    h1 = jnp.maximum(h1, 0.0)
    f = jnp.dot(h1.astype(jnp.bfloat16), w2_ref[...],
                preferred_element_type=jnp.float32) + b2_ref[...]

    # ---- AddNorm 2 ----
    o_ref[...] = layer_norm(y + f, g2_ref[...], be2_ref[...])


def gpt_encoder_block(x, params, num_heads):
    B, T, D = x.shape
    H = num_heads
    HD = params["wq"].shape[1]                      # H * hd
    hd = HD // H

    # ---- wrapper-side packing / casts (done once by XLA outside the kernel) ----
    wqkv = jnp.concatenate([params["wq"], params["wk"], params["wv"]],
                           axis=1).astype(jnp.bfloat16)          # (D, 3*H*hd)
    wo = params["wo"].astype(jnp.bfloat16)                        # (H*hd, D), unreplicated
    w1 = params["w1"].astype(jnp.bfloat16)
    w2 = params["w2"].astype(jnp.bfloat16)

    x2d = x.reshape(B * T, D).astype(jnp.float32)

    ops = [x2d, wqkv, wo,
           params["g1"], params["be1"], w1, params["b1"],
           w2, params["b2"], params["g2"], params["be2"]]

    def resident_spec(a):
        nd = a.ndim
        # constant block index -> block stays resident across grid steps (no re-DMA)
        return pl.BlockSpec(a.shape, lambda b, nd=nd: (0,) * nd)

    in_specs = ([pl.BlockSpec((T, D), lambda b: (b, 0))]
                + [resident_spec(a) for a in ops[1:]])

    kernel = functools.partial(gpt_block_kernel, num_heads=H, head_dim=hd)

    out2d = pl.pallas_call(
        kernel,
        out_shape=jax.ShapeDtypeStruct((B * T, D), jnp.float32),
        grid_spec=pltpu.PrefetchScalarGridSpec(
            num_scalar_prefetch=0,
            grid=(B,),                              # one grid step per batch element
            in_specs=in_specs,
            out_specs=pl.BlockSpec((T, D), lambda b: (b, 0)),
        ),
        compiler_params=pltpu.CompilerParams(
            dimension_semantics=("parallel",),      # independent batches -> both TCs on v7x
        ),
    )(*ops)
    return out2d.reshape(B, T, D)


def ref_forward(x, p, num_heads):
    """Pure-JAX (f32) reference mirroring the PyTorch forward (dropout=0, training path)."""
    B, T, D = x.shape
    hd = p["wq"].shape[1] // num_heads
    q, k, v = x @ p["wq"], x @ p["wk"], x @ p["wv"]

    def split(z):
        return z.reshape(B, T, num_heads, hd).transpose(0, 2, 1, 3)

    qh, kh, vh = split(q), split(k), split(v)
    s = jnp.einsum("bhqd,bhkd->bhqk", qh, kh) / jnp.sqrt(jnp.float32(hd))
    mask = jnp.arange(T)[None, :] <= jnp.arange(T)[:, None]
    s = jnp.where(mask, s, -1000000.0)
    a = jax.nn.softmax(s, axis=-1)
    o = jnp.einsum("bhqk,bhkd->bhqd", a, vh).transpose(0, 2, 1, 3).reshape(B, T, -1)
    x2 = o @ p["wo"]

    def ln(z, g, b):
        mu = z.mean(-1, keepdims=True)
        var = ((z - mu) ** 2).mean(-1, keepdims=True)
        return (z - mu) / jnp.sqrt(var + 1e-5) * g + b

    y = ln(x2 + x, p["g1"][0], p["be1"][0])
    h = jax.nn.relu(y @ p["w1"] + p["b1"][0])
    f = h @ p["w2"] + p["b2"][0]
    return ln(f + y, p["g2"][0], p["be2"][0])


if __name__ == "__main__":
    # shapes consistent with the module:
    #   num_hiddens = key/query/value_size = 32, num_heads = 4 (head dim = num_hiddens = 32),
    #   ffn_num_input = 32, ffn_num_hiddens = 64, batch = 2, num_steps = 8
    B, T, D = 2, 8, 32
    H = 4
    FFN_H = 64

    key = jax.random.PRNGKey(0)
    ks = jax.random.split(key, 8)
    x = jax.random.normal(ks[0], (B, T, D), dtype=jnp.float32)

    params = {
        "wq": 0.05 * jax.random.normal(ks[1], (D, D * H), dtype=jnp.float32),
        "wk": 0.05 * jax.random.normal(ks[2], (D, D * H), dtype=jnp.float32),
        "wv": 0.05 * jax.random.normal(ks[3], (D, D * H), dtype=jnp.float32),
        "wo": 0.05 * jax.random.normal(ks[4], (D * H, D), dtype=jnp.float32),
        "g1": jnp.ones((1, D), jnp.float32),
        "be1": jnp.zeros((1, D), jnp.float32),
        "w1": 0.05 * jax.random.normal(ks[5], (D, FFN_H), dtype=jnp.float32),
        "b1": 0.01 * jax.random.normal(ks[6], (1, FFN_H), dtype=jnp.float32),
        "w2": 0.05 * jax.random.normal(ks[7], (FFN_H, D), dtype=jnp.float32),
        "b2": jnp.zeros((1, D), jnp.float32),
        "g2": jnp.ones((1, D), jnp.float32),
        "be2": jnp.zeros((1, D), jnp.float32),
    }

    out = jax.block_until_ready(gpt_encoder_block(x, params, H))
    ref = jax.block_until_ready(ref_forward(x, params, H))

    assert out.shape == (B, T, D)
    # tolerance accounts for bf16 matmul operands (f32 accumulation) and the approx (EUP)
    # reciprocal in the softmax denominator vs the all-f32 reference
    assert jnp.allclose(out, ref, atol=2e-2, rtol=2e-2), "mismatch vs JAX reference"
    print("KERNEL_OK")
</pallas_src>

<mosaic_0001>
module attributes {stable_mosaic.version = 11 : i64} {
  func.func @gpt_block_kernel(%arg0: i32, %arg1: memref<8x32xf32, #tpu.memory_space<vmem>>, %arg2: memref<32x384xbf16, #tpu.memory_space<vmem>>, %arg3: memref<128x32xbf16, #tpu.memory_space<vmem>>, %arg4: memref<1x32xf32, #tpu.memory_space<vmem>>, %arg5: memref<1x32xf32, #tpu.memory_space<vmem>>, %arg6: memref<32x64xbf16, #tpu.memory_space<vmem>>, %arg7: memref<1x64xf32, #tpu.memory_space<vmem>>, %arg8: memref<64x32xbf16, #tpu.memory_space<vmem>>, %arg9: memref<1x32xf32, #tpu.memory_space<vmem>>, %arg10: memref<1x32xf32, #tpu.memory_space<vmem>>, %arg11: memref<1x32xf32, #tpu.memory_space<vmem>>, %arg12: memref<8x32xf32, #tpu.memory_space<vmem>>) attributes {dimension_semantics = [#tpu.dimension_semantics<parallel>], iteration_bounds = array<i64: 2>, scalar_prefetch = 0 : i64, scratch_operands = 0 : i64, tpu.core_type = #tpu.core_type<tc>, window_params = [{transform_indices = @transform_0, window_bounds = array<i64: 8, 32>}, {pipeline_mode = #tpu.pipeline_mode<synchronous>, transform_indices = @transform_1, window_bounds = array<i64: 32, 384>}, {pipeline_mode = #tpu.pipeline_mode<synchronous>, transform_indices = @transform_2, window_bounds = array<i64: 128, 32>}, {pipeline_mode = #tpu.pipeline_mode<synchronous>, transform_indices = @transform_3, window_bounds = array<i64: 1, 32>}, {pipeline_mode = #tpu.pipeline_mode<synchronous>, transform_indices = @transform_4, window_bounds = array<i64: 1, 32>}, {pipeline_mode = #tpu.pipeline_mode<synchronous>, transform_indices = @transform_5, window_bounds = array<i64: 32, 64>}, {pipeline_mode = #tpu.pipeline_mode<synchronous>, transform_indices = @transform_6, window_bounds = array<i64: 1, 64>}, {pipeline_mode = #tpu.pipeline_mode<synchronous>, transform_indices = @transform_7, window_bounds = array<i64: 64, 32>}, {pipeline_mode = #tpu.pipeline_mode<synchronous>, transform_indices = @transform_8, window_bounds = array<i64: 1, 32>}, {pipeline_mode = #tpu.pipeline_mode<synchronous>, transform_indices = @transform_9, window_bounds = array<i64: 1, 32>}, {pipeline_mode = #tpu.pipeline_mode<synchronous>, transform_indices = @transform_10, window_bounds = array<i64: 1, 32>}, {transform_indices = @transform_11, window_bounds = array<i64: 8, 32>}]} {
    %c0 = arith.constant 0 : index
    %c0_0 = arith.constant 0 : index
    %0 = vector.load %arg1[%c0, %c0_0] : memref<8x32xf32, #tpu.memory_space<vmem>>, vector<8x32xf32>
    %1 = arith.truncf %0 : vector<8x32xf32> to vector<8x32xbf16>
    %c0_1 = arith.constant 0 : index
    %c0_2 = arith.constant 0 : index
    %2 = vector.load %arg2[%c0_1, %c0_2] : memref<32x384xbf16, #tpu.memory_space<vmem>>, vector<32x384xbf16>
    %cst = arith.constant dense<0.000000e+00> : vector<8x384xf32>
    %3 = tpu.matmul %1, %2, %cst {dimension_numbers = #tpu.dot_dimension_numbers<[1], [0], [0], [1], [0, 0, 1, 1], [], []>} : vector<8x32xbf16>, vector<32x384xbf16>, vector<8x384xf32> -> vector<8x384xf32>
    %4 = tpu.iota {dimensions = array<i32: 0>} : vector<8x8xi32>
    %5 = tpu.iota {dimensions = array<i32: 1>} : vector<8x8xi32>
    %6 = arith.cmpi sle, %5, %4 : vector<8x8xi32>
    %7 = vector.extract_strided_slice %3 {offsets = [0, 0], sizes = [8, 32], strides = [1, 1]} : vector<8x384xf32> to vector<8x32xf32>
    %8 = arith.truncf %7 : vector<8x32xf32> to vector<8x32xbf16>
    %9 = vector.extract_strided_slice %3 {offsets = [0, 128], sizes = [8, 32], strides = [1, 1]} : vector<8x384xf32> to vector<8x32xf32>
    %10 = arith.truncf %9 : vector<8x32xf32> to vector<8x32xbf16>
    %11 = vector.extract_strided_slice %3 {offsets = [0, 256], sizes = [8, 32], strides = [1, 1]} : vector<8x384xf32> to vector<8x32xf32>
    %12 = arith.truncf %11 : vector<8x32xf32> to vector<8x32xbf16>
    %cst_3 = arith.constant dense<0.000000e+00> : vector<8x8xf32>
    %13 = tpu.matmul %8, %10, %cst_3 {dimension_numbers = #tpu.dot_dimension_numbers<[1], [1], [0], [0], [0, 0, 1, 0], [], []>} : vector<8x32xbf16>, vector<8x32xbf16>, vector<8x8xf32> -> vector<8x8xf32>
    %cst_4 = arith.constant 0.176776692 : f32
    %14 = vector.broadcast %cst_4 : f32 to vector<8x8xf32>
    %15 = arith.mulf %13, %14 : vector<8x8xf32>
    %cst_5 = arith.constant -1.000000e+06 : f32
    %16 = vector.broadcast %cst_5 : f32 to vector<8x8xf32>
    %17 = arith.select %6, %15, %16 : vector<8x8xi1>, vector<8x8xf32>
    %cst_6 = arith.constant dense<0xFF800000> : vector<8xf32>
    %18 = vector.multi_reduction <maximumf>, %17, %cst_6 [1] : vector<8x8xf32> to vector<8xf32>
    %19 = vector.shape_cast %18 : vector<8xf32> to vector<8x1xf32>
    %20 = vector.broadcast %19 : vector<8x1xf32> to vector<8x8xf32>
    %21 = arith.subf %17, %20 : vector<8x8xf32>
    %22 = math.exp %21 : vector<8x8xf32>
    %cst_7 = arith.constant dense<0.000000e+00> : vector<8xf32>
    %23 = vector.multi_reduction <add>, %22, %cst_7 [1] : vector<8x8xf32> to vector<8xf32>
    %24 = vector.shape_cast %23 : vector<8xf32> to vector<8x1xf32>
    %25 = tpu.reciprocal %24 {approx = true} : vector<8x1xf32> -> vector<8x1xf32>
    %26 = vector.broadcast %25 : vector<8x1xf32> to vector<8x8xf32>
    %27 = arith.mulf %22, %26 : vector<8x8xf32>
    %28 = arith.truncf %27 : vector<8x8xf32> to vector<8x8xbf16>
    %cst_8 = arith.constant dense<0.000000e+00> : vector<8x32xf32>
    %29 = tpu.matmul %28, %12, %cst_8 {dimension_numbers = #tpu.dot_dimension_numbers<[1], [0], [0], [1], [0, 0, 1, 1], [], []>} : vector<8x8xbf16>, vector<8x32xbf16>, vector<8x32xf32> -> vector<8x32xf32>
    %30 = vector.extract_strided_slice %3 {offsets = [0, 32], sizes = [8, 32], strides = [1, 1]} : vector<8x384xf32> to vector<8x32xf32>
    %31 = arith.truncf %30 : vector<8x32xf32> to vector<8x32xbf16>
    %32 = vector.extract_strided_slice %3 {offsets = [0, 160], sizes = [8, 32], strides = [1, 1]} : vector<8x384xf32> to vector<8x32xf32>
    %33 = arith.truncf %32 : vector<8x32xf32> to vector<8x32xbf16>
    %34 = vector.extract_strided_slice %3 {offsets = [0, 288], sizes = [8, 32], strides = [1, 1]} : vector<8x384xf32> to vector<8x32xf32>
    %35 = arith.truncf %34 : vector<8x32xf32> to vector<8x32xbf16>
    %cst_9 = arith.constant dense<0.000000e+00> : vector<8x8xf32>
    %36 = tpu.matmul %31, %33, %cst_9 {dimension_numbers = #tpu.dot_dimension_numbers<[1], [1], [0], [0], [0, 0, 1, 0], [], []>} : vector<8x32xbf16>, vector<8x32xbf16>, vector<8x8xf32> -> vector<8x8xf32>
    %cst_10 = arith.constant 0.176776692 : f32
    %37 = vector.broadcast %cst_10 : f32 to vector<8x8xf32>
    %38 = arith.mulf %36, %37 : vector<8x8xf32>
    %cst_11 = arith.constant -1.000000e+06 : f32
    %39 = vector.broadcast %cst_11 : f32 to vector<8x8xf32>
    %40 = arith.select %6, %38, %39 : vector<8x8xi1>, vector<8x8xf32>
    %cst_12 = arith.constant dense<0xFF800000> : vector<8xf32>
    %41 = vector.multi_reduction <maximumf>, %40, %cst_12 [1] : vector<8x8xf32> to vector<8xf32>
    %42 = vector.shape_cast %41 : vector<8xf32> to vector<8x1xf32>
    %43 = vector.broadcast %42 : vector<8x1xf32> to vector<8x8xf32>
    %44 = arith.subf %40, %43 : vector<8x8xf32>
    %45 = math.exp %44 : vector<8x8xf32>
    %cst_13 = arith.constant dense<0.000000e+00> : vector<8xf32>
    %46 = vector.multi_reduction <add>, %45, %cst_13 [1] : vector<8x8xf32> to vector<8xf32>
    %47 = vector.shape_cast %46 : vector<8xf32> to vector<8x1xf32>
    %48 = tpu.reciprocal %47 {approx = true} : vector<8x1xf32> -> vector<8x1xf32>
    %49 = vector.broadcast %48 : vector<8x1xf32> to vector<8x8xf32>
    %50 = arith.mulf %45, %49 : vector<8x8xf32>
    %51 = arith.truncf %50 : vector<8x8xf32> to vector<8x8xbf16>
    %cst_14 = arith.constant dense<0.000000e+00> : vector<8x32xf32>
    %52 = tpu.matmul %51, %35, %cst_14 {dimension_numbers = #tpu.dot_dimension_numbers<[1], [0], [0], [1], [0, 0, 1, 1], [], []>} : vector<8x8xbf16>, vector<8x32xbf16>, vector<8x32xf32> -> vector<8x32xf32>
    %53 = vector.extract_strided_slice %3 {offsets = [0, 64], sizes = [8, 32], strides = [1, 1]} : vector<8x384xf32> to vector<8x32xf32>
    %54 = arith.truncf %53 : vector<8x32xf32> to vector<8x32xbf16>
    %55 = vector.extract_strided_slice %3 {offsets = [0, 192], sizes = [8, 32], strides = [1, 1]} : vector<8x384xf32> to vector<8x32xf32>
    %56 = arith.truncf %55 : vector<8x32xf32> to vector<8x32xbf16>
    %57 = vector.extract_strided_slice %3 {offsets = [0, 320], sizes = [8, 32], strides = [1, 1]} : vector<8x384xf32> to vector<8x32xf32>
    %58 = arith.truncf %57 : vector<8x32xf32> to vector<8x32xbf16>
    %cst_15 = arith.constant dense<0.000000e+00> : vector<8x8xf32>
    %59 = tpu.matmul %54, %56, %cst_15 {dimension_numbers = #tpu.dot_dimension_numbers<[1], [1], [0], [0], [0, 0, 1, 0], [], []>} : vector<8x32xbf16>, vector<8x32xbf16>, vector<8x8xf32> -> vector<8x8xf32>
    %cst_16 = arith.constant 0.176776692 : f32
    %60 = vector.broadcast %cst_16 : f32 to vector<8x8xf32>
    %61 = arith.mulf %59, %60 : vector<8x8xf32>
    %cst_17 = arith.constant -1.000000e+06 : f32
    %62 = vector.broadcast %cst_17 : f32 to vector<8x8xf32>
    %63 = arith.select %6, %61, %62 : vector<8x8xi1>, vector<8x8xf32>
    %cst_18 = arith.constant dense<0xFF800000> : vector<8xf32>
    %64 = vector.multi_reduction <maximumf>, %63, %cst_18 [1] : vector<8x8xf32> to vector<8xf32>
    %65 = vector.shape_cast %64 : vector<8xf32> to vector<8x1xf32>
    %66 = vector.broadcast %65 : vector<8x1xf32> to vector<8x8xf32>
    %67 = arith.subf %63, %66 : vector<8x8xf32>
    %68 = math.exp %67 : vector<8x8xf32>
    %cst_19 = arith.constant dense<0.000000e+00> : vector<8xf32>
    %69 = vector.multi_reduction <add>, %68, %cst_19 [1] : vector<8x8xf32> to vector<8xf32>
    %70 = vector.shape_cast %69 : vector<8xf32> to vector<8x1xf32>
    %71 = tpu.reciprocal %70 {approx = true} : vector<8x1xf32> -> vector<8x1xf32>
    %72 = vector.broadcast %71 : vector<8x1xf32> to vector<8x8xf32>
    %73 = arith.mulf %68, %72 : vector<8x8xf32>
    %74 = arith.truncf %73 : vector<8x8xf32> to vector<8x8xbf16>
    %cst_20 = arith.constant dense<0.000000e+00> : vector<8x32xf32>
    %75 = tpu.matmul %74, %58, %cst_20 {dimension_numbers = #tpu.dot_dimension_numbers<[1], [0], [0], [1], [0, 0, 1, 1], [], []>} : vector<8x8xbf16>, vector<8x32xbf16>, vector<8x32xf32> -> vector<8x32xf32>
    %76 = vector.extract_strided_slice %3 {offsets = [0, 96], sizes = [8, 32], strides = [1, 1]} : vector<8x384xf32> to vector<8x32xf32>
    %77 = arith.truncf %76 : vector<8x32xf32> to vector<8x32xbf16>
    %78 = vector.extract_strided_slice %3 {offsets = [0, 224], sizes = [8, 32], strides = [1, 1]} : vector<8x384xf32> to vector<8x32xf32>
    %79 = arith.truncf %78 : vector<8x32xf32> to vector<8x32xbf16>
    %80 = vector.extract_strided_slice %3 {offsets = [0, 352], sizes = [8, 32], strides = [1, 1]} : vector<8x384xf32> to vector<8x32xf32>
    %81 = arith.truncf %80 : vector<8x32xf32> to vector<8x32xbf16>
    %cst_21 = arith.constant dense<0.000000e+00> : vector<8x8xf32>
    %82 = tpu.matmul %77, %79, %cst_21 {dimension_numbers = #tpu.dot_dimension_numbers<[1], [1], [0], [0], [0, 0, 1, 0], [], []>} : vector<8x32xbf16>, vector<8x32xbf16>, vector<8x8xf32> -> vector<8x8xf32>
    %cst_22 = arith.constant 0.176776692 : f32
    %83 = vector.broadcast %cst_22 : f32 to vector<8x8xf32>
    %84 = arith.mulf %82, %83 : vector<8x8xf32>
    %cst_23 = arith.constant -1.000000e+06 : f32
    %85 = vector.broadcast %cst_23 : f32 to vector<8x8xf32>
    %86 = arith.select %6, %84, %85 : vector<8x8xi1>, vector<8x8xf32>
    %cst_24 = arith.constant dense<0xFF800000> : vector<8xf32>
    %87 = vector.multi_reduction <maximumf>, %86, %cst_24 [1] : vector<8x8xf32> to vector<8xf32>
    %88 = vector.shape_cast %87 : vector<8xf32> to vector<8x1xf32>
    %89 = vector.broadcast %88 : vector<8x1xf32> to vector<8x8xf32>
    %90 = arith.subf %86, %89 : vector<8x8xf32>
    %91 = math.exp %90 : vector<8x8xf32>
    %cst_25 = arith.constant dense<0.000000e+00> : vector<8xf32>
    %92 = vector.multi_reduction <add>, %91, %cst_25 [1] : vector<8x8xf32> to vector<8xf32>
    %93 = vector.shape_cast %92 : vector<8xf32> to vector<8x1xf32>
    %94 = tpu.reciprocal %93 {approx = true} : vector<8x1xf32> -> vector<8x1xf32>
    %95 = vector.broadcast %94 : vector<8x1xf32> to vector<8x8xf32>
    %96 = arith.mulf %91, %95 : vector<8x8xf32>
    %97 = arith.truncf %96 : vector<8x8xf32> to vector<8x8xbf16>
    %cst_26 = arith.constant dense<0.000000e+00> : vector<8x32xf32>
    %98 = tpu.matmul %97, %81, %cst_26 {dimension_numbers = #tpu.dot_dimension_numbers<[1], [0], [0], [1], [0, 0, 1, 1], [], []>} : vector<8x8xbf16>, vector<8x32xbf16>, vector<8x32xf32> -> vector<8x32xf32>
    %99 = tpu.concatenate %29, %52, %75, %98 in 1 : vector<8x32xf32>, vector<8x32xf32>, vector<8x32xf32>, vector<8x32xf32> -> vector<8x128xf32>
    %100 = arith.truncf %99 : vector<8x128xf32> to vector<8x128xbf16>
    %c0_27 = arith.constant 0 : index
    %c0_28 = arith.constant 0 : index
    %101 = vector.load %arg3[%c0_27, %c0_28] : memref<128x32xbf16, #tpu.memory_space<vmem>>, vector<128x32xbf16>
    %cst_29 = arith.constant dense<0.000000e+00> : vector<8x32xf32>
    %102 = tpu.matmul %100, %101, %cst_29 {dimension_numbers = #tpu.dot_dimension_numbers<[1], [0], [0], [1], [0, 0, 1, 1], [], []>} : vector<8x128xbf16>, vector<128x32xbf16>, vector<8x32xf32> -> vector<8x32xf32>
    %103 = arith.addf %0, %102 : vector<8x32xf32>
    %c0_30 = arith.constant 0 : index
    %c0_31 = arith.constant 0 : index
    %104 = vector.load %arg4[%c0_30, %c0_31] : memref<1x32xf32, #tpu.memory_space<vmem>>, vector<1x32xf32>
    %c0_32 = arith.constant 0 : index
    %c0_33 = arith.constant 0 : index
    %105 = vector.load %arg5[%c0_32, %c0_33] : memref<1x32xf32, #tpu.memory_space<vmem>>, vector<1x32xf32>
    %cst_34 = arith.constant dense<0.000000e+00> : vector<8xf32>
    %106 = vector.multi_reduction <add>, %103, %cst_34 [1] : vector<8x32xf32> to vector<8xf32>
    %107 = vector.shape_cast %106 : vector<8xf32> to vector<8x1xf32>
    %cst_35 = arith.constant 3.200000e+01 : f32
    %108 = vector.broadcast %cst_35 : f32 to vector<8x1xf32>
    %109 = arith.divf %107, %108 : vector<8x1xf32>
    %110 = arith.mulf %103, %103 : vector<8x32xf32>
    %cst_36 = arith.constant dense<0.000000e+00> : vector<8xf32>
    %111 = vector.multi_reduction <add>, %110, %cst_36 [1] : vector<8x32xf32> to vector<8xf32>
    %112 = vector.shape_cast %111 : vector<8xf32> to vector<8x1xf32>
    %cst_37 = arith.constant 3.200000e+01 : f32
    %113 = vector.broadcast %cst_37 : f32 to vector<8x1xf32>
    %114 = arith.divf %112, %113 : vector<8x1xf32>
    %115 = arith.mulf %109, %109 : vector<8x1xf32>
    %116 = arith.subf %114, %115 : vector<8x1xf32>
    %cst_38 = arith.constant 0.000000e+00 : f32
    %117 = vector.broadcast %cst_38 : f32 to vector<8x1xf32>
    %118 = arith.maximumf %116, %117 : vector<8x1xf32>
    %119 = vector.broadcast %109 : vector<8x1xf32> to vector<8x32xf32>
    %120 = arith.subf %103, %119 : vector<8x32xf32>
    %cst_39 = arith.constant 9.99999974E-6 : f32
    %121 = vector.broadcast %cst_39 : f32 to vector<8x1xf32>
    %122 = arith.addf %118, %121 : vector<8x1xf32>
    %123 = math.rsqrt %122 : vector<8x1xf32>
    %124 = vector.broadcast %123 : vector<8x1xf32> to vector<8x32xf32>
    %125 = arith.mulf %120, %124 : vector<8x32xf32>
    %126 = vector.broadcast %104 : vector<1x32xf32> to vector<8x32xf32>
    %127 = arith.mulf %125, %126 : vector<8x32xf32>
    %128 = vector.broadcast %105 : vector<1x32xf32> to vector<8x32xf32>
    %129 = arith.addf %127, %128 : vector<8x32xf32>
    %130 = arith.truncf %129 : vector<8x32xf32> to vector<8x32xbf16>
    %c0_40 = arith.constant 0 : index
    %c0_41 = arith.constant 0 : index
    %131 = vector.load %arg6[%c0_40, %c0_41] : memref<32x64xbf16, #tpu.memory_space<vmem>>, vector<32x64xbf16>
    %cst_42 = arith.constant dense<0.000000e+00> : vector<8x64xf32>
    %132 = tpu.matmul %130, %131, %cst_42 {dimension_numbers = #tpu.dot_dimension_numbers<[1], [0], [0], [1], [0, 0, 1, 1], [], []>} : vector<8x32xbf16>, vector<32x64xbf16>, vector<8x64xf32> -> vector<8x64xf32>
    %c0_43 = arith.constant 0 : index
    %c0_44 = arith.constant 0 : index
    %133 = vector.load %arg7[%c0_43, %c0_44] : memref<1x64xf32, #tpu.memory_space<vmem>>, vector<1x64xf32>
    %134 = vector.broadcast %133 : vector<1x64xf32> to vector<8x64xf32>
    %135 = arith.addf %132, %134 : vector<8x64xf32>
    %cst_45 = arith.constant 0.000000e+00 : f32
    %136 = vector.broadcast %cst_45 : f32 to vector<8x64xf32>
    %137 = arith.maximumf %135, %136 : vector<8x64xf32>
    %138 = arith.truncf %137 : vector<8x64xf32> to vector<8x64xbf16>
    %c0_46 = arith.constant 0 : index
    %c0_47 = arith.constant 0 : index
    %139 = vector.load %arg8[%c0_46, %c0_47] : memref<64x32xbf16, #tpu.memory_space<vmem>>, vector<64x32xbf16>
    %cst_48 = arith.constant dense<0.000000e+00> : vector<8x32xf32>
    %140 = tpu.matmul %138, %139, %cst_48 {dimension_numbers = #tpu.dot_dimension_numbers<[1], [0], [0], [1], [0, 0, 1, 1], [], []>} : vector<8x64xbf16>, vector<64x32xbf16>, vector<8x32xf32> -> vector<8x32xf32>
    %c0_49 = arith.constant 0 : index
    %c0_50 = arith.constant 0 : index
    %141 = vector.load %arg9[%c0_49, %c0_50] : memref<1x32xf32, #tpu.memory_space<vmem>>, vector<1x32xf32>
    %142 = vector.broadcast %141 : vector<1x32xf32> to vector<8x32xf32>
    %143 = arith.addf %140, %142 : vector<8x32xf32>
    %144 = arith.addf %129, %143 : vector<8x32xf32>
    %c0_51 = arith.constant 0 : index
    %c0_52 = arith.constant 0 : index
    %145 = vector.load %arg10[%c0_51, %c0_52] : memref<1x32xf32, #tpu.memory_space<vmem>>, vector<1x32xf32>
    %c0_53 = arith.constant 0 : index
    %c0_54 = arith.constant 0 : index
    %146 = vector.load %arg11[%c0_53, %c0_54] : memref<1x32xf32, #tpu.memory_space<vmem>>, vector<1x32xf32>
    %cst_55 = arith.constant dense<0.000000e+00> : vector<8xf32>
    %147 = vector.multi_reduction <add>, %144, %cst_55 [1] : vector<8x32xf32> to vector<8xf32>
    %148 = vector.shape_cast %147 : vector<8xf32> to vector<8x1xf32>
    %cst_56 = arith.constant 3.200000e+01 : f32
    %149 = vector.broadcast %cst_56 : f32 to vector<8x1xf32>
    %150 = arith.divf %148, %149 : vector<8x1xf32>
    %151 = arith.mulf %144, %144 : vector<8x32xf32>
    %cst_57 = arith.constant dense<0.000000e+00> : vector<8xf32>
    %152 = vector.multi_reduction <add>, %151, %cst_57 [1] : vector<8x32xf32> to vector<8xf32>
    %153 = vector.shape_cast %152 : vector<8xf32> to vector<8x1xf32>
    %cst_58 = arith.constant 3.200000e+01 : f32
    %154 = vector.broadcast %cst_58 : f32 to vector<8x1xf32>
    %155 = arith.divf %153, %154 : vector<8x1xf32>
    %156 = arith.mulf %150, %150 : vector<8x1xf32>
    %157 = arith.subf %155, %156 : vector<8x1xf32>
    %cst_59 = arith.constant 0.000000e+00 : f32
    %158 = vector.broadcast %cst_59 : f32 to vector<8x1xf32>
    %159 = arith.maximumf %157, %158 : vector<8x1xf32>
    %160 = vector.broadcast %150 : vector<8x1xf32> to vector<8x32xf32>
    %161 = arith.subf %144, %160 : vector<8x32xf32>
    %cst_60 = arith.constant 9.99999974E-6 : f32
    %162 = vector.broadcast %cst_60 : f32 to vector<8x1xf32>
    %163 = arith.addf %159, %162 : vector<8x1xf32>
    %164 = math.rsqrt %163 : vector<8x1xf32>
    %165 = vector.broadcast %164 : vector<8x1xf32> to vector<8x32xf32>
    %166 = arith.mulf %161, %165 : vector<8x32xf32>
    %167 = vector.broadcast %145 : vector<1x32xf32> to vector<8x32xf32>
    %168 = arith.mulf %166, %167 : vector<8x32xf32>
    %169 = vector.broadcast %146 : vector<1x32xf32> to vector<8x32xf32>
    %170 = arith.addf %168, %169 : vector<8x32xf32>
    %c0_61 = arith.constant 0 : index
    %c0_62 = arith.constant 0 : index
    %171 = vector.load %arg12[%c0_61, %c0_62] : memref<8x32xf32, #tpu.memory_space<vmem>>, vector<8x32xf32>
    tpu.vector_store %arg12[%c0_61, %c0_62], %170 {strides = array<i32>} : memref<8x32xf32, #tpu.memory_space<vmem>>, vector<8x32xf32>,
    return
  }
  func.func @transform_0(%arg0: i32) -> (i32, i32) {
    %c0_i32 = arith.constant 0 : i32
    %c0_i32_0 = arith.constant 0 : i32
    return %arg0, %c0_i32 : i32, i32
  }
  func.func @transform_1(%arg0: i32) -> (i32, i32) {
    %c0_i32 = arith.constant 0 : i32
    %c0_i32_0 = arith.constant 0 : i32
    %c0_i32_1 = arith.constant 0 : i32
    return %c0_i32, %c0_i32_0 : i32, i32
  }
  func.func @transform_2(%arg0: i32) -> (i32, i32) {
    %c0_i32 = arith.constant 0 : i32
    %c0_i32_0 = arith.constant 0 : i32
    %c0_i32_1 = arith.constant 0 : i32
    return %c0_i32, %c0_i32_0 : i32, i32
  }
  func.func @transform_3(%arg0: i32) -> (i32, i32) {
    %c0_i32 = arith.constant 0 : i32
    %c0_i32_0 = arith.constant 0 : i32
    %c0_i32_1 = arith.constant 0 : i32
    return %c0_i32, %c0_i32_0 : i32, i32
  }
  func.func @transform_4(%arg0: i32) -> (i32, i32) {
    %c0_i32 = arith.constant 0 : i32
    %c0_i32_0 = arith.constant 0 : i32
    %c0_i32_1 = arith.constant 0 : i32
    return %c0_i32, %c0_i32_0 : i32, i32
  }
  func.func @transform_5(%arg0: i32) -> (i32, i32) {
    %c0_i32 = arith.constant 0 : i32
    %c0_i32_0 = arith.constant 0 : i32
    %c0_i32_1 = arith.constant 0 : i32
    return %c0_i32, %c0_i32_0 : i32, i32
  }
  func.func @transform_6(%arg0: i32) -> (i32, i32) {
    %c0_i32 = arith.constant 0 : i32
    %c0_i32_0 = arith.constant 0 : i32
    %c0_i32_1 = arith.constant 0 : i32
    return %c0_i32, %c0_i32_0 : i32, i32
  }
  func.func @transform_7(%arg0: i32) -> (i32, i32) {
    %c0_i32 = arith.constant 0 : i32
    %c0_i32_0 = arith.constant 0 : i32
    %c0_i32_1 = arith.constant 0 : i32
    return %c0_i32, %c0_i32_0 : i32, i32
  }
  func.func @transform_8(%arg0: i32) -> (i32, i32) {
    %c0_i32 = arith.constant 0 : i32
    %c0_i32_0 = arith.constant 0 : i32
    %c0_i32_1 = arith.constant 0 : i32
    return %c0_i32, %c0_i32_0 : i32, i32
  }
  func.func @transform_9(%arg0: i32) -> (i32, i32) {
    %c0_i32 = arith.constant 0 : i32
    %c0_i32_0 = arith.constant 0 : i32
    %c0_i32_1 = arith.constant 0 : i32
    return %c0_i32, %c0_i32_0 : i32, i32
  }
  func.func @transform_10(%arg0: i32) -> (i32, i32) {
    %c0_i32 = arith.constant 0 : i32
    %c0_i32_0 = arith.constant 0 : i32
    %c0_i32_1 = arith.constant 0 : i32
    return %c0_i32, %c0_i32_0 : i32, i32
  }
  func.func @transform_11(%arg0: i32) -> (i32, i32) {
    %c0_i32 = arith.constant 0 : i32
    %c0_i32_0 = arith.constant 0 : i32
    return %arg0, %c0_i32 : i32, i32
  }
}

</mosaic_0001>

<bundles_post_ra>
// kernel: tpu_custom_call.1
= control target key start
LH: loop header
LB: loop body
LE: loop exit
PB: predicated region body
PF: predicated region fallthrough
CT: control target
= control target key end

     0   :  { %s2050_s0 = inlined_call_operand.vmem [shape: f32[16,32], index: 0, kind: input, shape index: {}]   ;;  %s2051_s1 = inlined_call_operand.vmem [shape: bf16[32,384], index: 1, kind: input, shape index: {}]   ;;  %s2052_s2 = inlined_call_operand.vmem [shape: bf16[128,32], index: 2, kind: input, shape index: {}]   ;;  %s2053_s3 = inlined_call_operand.vmem [shape: f32[1,32], index: 3, kind: input, shape index: {}]   ;;  %s2054_s4 = inlined_call_operand.vmem [shape: f32[1,32], index: 4, kind: input, shape index: {}]   ;;  %s2055_s5 = inlined_call_operand.vmem [shape: bf16[32,64], index: 5, kind: input, shape index: {}]   ;;  %s2056_s6 = inlined_call_operand.vmem [shape: f32[1,64], index: 6, kind: input, shape index: {}]   ;;  %s2057_s7 = inlined_call_operand.vmem [shape: bf16[64,32], index: 7, kind: input, shape index: {}]   ;;  %s2058_s8 = inlined_call_operand.vmem [shape: f32[1,32], index: 8, kind: input, shape index: {}]   ;;  %s2059_s9 = inlined_call_operand.vmem [shape: f32[1,32], index: 9, kind: input, shape index: {}]   ;;  %s2060_s10 = inlined_call_operand.vmem [shape: f32[1,32], index: 10, kind: input, shape index: {}]   ;;  %s2061_s11 = inlined_call_operand.hbm [shape: f32[16,32], index: 11, kind: output, shape index: {}]  }
   0x1   :  { %2063 = sst [smem:[#allocation5_spill]] %s2050_s0 }
   0x2   :  { %2064 = sst [smem:[#allocation6_spill]] %s2051_s1 }
   0x3   :  { %2065 = sst [smem:[#allocation7_spill]] %s2052_s2 }
   0x4   :  { %16 = vsyncpa [#allocation3], 0 }
   0x5   :  { %18 = vsyncpa [#allocation3 + $0x1], 0  ;;  %s1775_s17 = smov 0   ;;  %s1777_s18 = smov 0  }
   0x6   :  { %s1779_s19 = smov 0   ;;  %s1781_s20 = smov 0  }
   0x7 LB: > { %s1796_s21 = sadd.s32 4294967295, %s1706_s20   ;;  %s1379_s22 = sadd.s32 4294967294, %s1706_s20   ;;  %s1706_s20 = sphi %s1781_s20, %s2075_s20   ;;  %s1702_s19 = sphi %s1779_s19, %s2074_s19   ;;  %s1698_s18 = sphi %s1777_s18, %s2073_s18   ;;  %s1694_s17 = sphi %s1775_s17, %s2072_s17  }
   0x8   : > { %s1800_s23 = sadd.s32 1, %s1706_s20   ;;  %s267_s24 = sadd.s32 1, %s1702_s19 }
   0x9   : > { %s264_s25 = ssub.s32 %s1706_s20, %s1800_s23  ;;  %p277_p0 = scmp.ne.s32.totalorder %s1702_s19, %s1698_s18 }
   0xa   : > { %p265_p1 = scmp.eq.s32.totalorder %s264_s25, 0  ;;  %p278_p2 = scmp.eq.s32.totalorder %s1796_s21, 1 }
   0xb   : > { %p283_p3 = scmp.ne.s32.totalorder %s1698_s18, %s1694_s17  ;;  %p284_p4 = scmp.eq.s32.totalorder %s1379_s22, 1 }
   0xc   : > { %s1811_s26 = scalar_select %p265_p1, %s1702_s19, %s267_s24  }
   0xd   : > { %p1813_p5 = por %p278_p2, %p277_p0  ;;  %p1817_p6 = por %p284_p4, %p283_p3 }
   0xe   : > { %p1382_p7 = scmp.ge.s32.totalorder %s1706_s20, 1  ;;  %p339_p8 = scmp.lt.s32.totalorder %s1706_s20, 3 }
  0x10   : > { %p340_p9 = pnand %p1382_p7, %p339_p8 }
  0x11   : > { %s2068_s1 = sld [smem:[#allocation6_spill]] (!%p340_p9)  ;;  %p378_p10 = scmp.lt.s32.totalorder (!%p340_p9), %s1796_s21, 1 }
  0x12   : > { %343 = sbr.rel (%p340_p9) target bundleno = 2135 (0x857), region = 64  ;;  %s2069_s0 = sld [smem:[#allocation5_spill]] (!%p340_p9) }
  0x13   : > { %s1711_s13 = smov (!%p340_p9), 64   ;;  %s2062_s14 = smov (!%p340_p9), 96  }
  0x14   : > { %s1713_s15 = smov (!%p340_p9), 32   ;;  %s2070_s2 = sld [smem:[#allocation7_spill]] (!%p340_p9) }
  0x17   : > { %v1604_v0 = vld [vmem:[%s2068_s1 + $0x1c] ss:$12 sps:$4 sm:$0xff]   ;;  %v1606_v1 = vld [vmem:[%s2068_s1 + $0x18] ss:$12 sps:$4 sm:$0xff]   ;;  %v1708_v2 = vmov 0   ;;  %s379_s24 = scalar_select %p378_p10, %s1796_s21, 1  ;;  %v510_v26 = vlaneseq }
  0x18   : > { %461 = vmatprep.mubr.bf16.mxu0 %v1708_v2  ;;  %441 = vmatprep.subr.bf16.mxu0 %v1604_v0  ;;  %v1607_v3 = vld [vmem:[%s2068_s1 + $0x4] ss:$12 sps:$4 sm:$0xff]   ;;  %v1609_v4 = vld [vmem:[%s2068_s1] ss:$12 sps:$4 sm:$0xff]   ;;  %vm425_vm0 = vcmask 261120   ;;  %v1709_v7 = vmov 0.0  }
  0x19   : > { %442 = vmatpush1.bf16.msra.mxu0 %v1606_v1  ;;  %s1384_s25 = sshll.u32 %s379_s24, 3  ;;  %1463 = vmatprep.subr.bf16.mxu1 %v1709_v7  ;;  %vm1710_vm1 = vmmov 0   ;;  %v1610_v15 = vld [vmem:[%s2068_s1 + $0x20] ss:$12 sps:$4 sm:$0xff]   ;;  %v1611_v16 = vld [vmem:[%s2068_s1 + $0x8] ss:$12 sps:$4 sm:$0xff]  }
  0x1a   : > { %443 = vmatprep.subr.bf16.mxu0 %v1607_v3  ;;  %s381_s12 = scalar_lea.vmem %s2069_s0, %s1384_s25  ;;  %1467 = vmatprep.mubr.msk.bf16.mxu1 %vm1710_vm1, %v1709_v7  ;;  %v511_v27 = vshrl.u32 %v510_v26, 7  ;;  %v513_v28 = vand.u32 127, %v510_v26  ;;  %vm566_vm3 = vcmask 64512   ;;  %vm582_vm4 = vcmask 1043456   ;;  %s1424_s24 = sshll.u32 %s1796_s21, 7 }
  0x1b   : > { %v1840_v5 = vld [vmem:[%s381_s12] sm:$0xff]  ;;  %1464 = vmatpush3.bf16.msra.mxu1 %v1610_v15  ;;  %vm978_vm5 = vcmask 523264   ;;  %vm980_vm6 = vcmask 785408   ;;  %s1318_s1 = scalar_lea.hbm %s2061_s11, %s1424_s24  ;;  %s1714_s12 = smov [#allocation2]  }
  0x1c   : > { %v384_v6 = vpack.c.bf16 %v1840_v5, %v1840_v5  ;;  %1465 = vmatprep.subr.bf16.mxu1 %v1709_v7  ;;  %vm514_vm2 = vcmp.le.s32.totalorder %v513_v28, %v511_v27  ;;  %s1650_s16 = sshll.u32 %s1714_s12, 4  ;;  %s1651_s16 = int_to_ptr.vmem [resolvable:$false] %s1650_s16 }
  0x1d   : > { %444 = vmatpush1.bf16.msra.mxu0 %v1609_v4  ;;  %s1652_s21 = scalar_lea.vmem %s1651_s16, 256 }
  0x1e   : > { %1471 = vmatprep.subr.bf16.mxu0 %v1709_v7 }
  0x1f   : > { %1466 = vmatpush3.bf16.msra.mxu1 %v1611_v16 }
  0x20   : > { %1391 = vmatmul.mubr.msk.bf16.vlgmr.msra.gmra.mxu0 %vm425_vm0, %v384_v6  ;;  %1477 = vmatprep.subr.bf16.mxu1 %v1709_v7 }
  0x21   : > { %1473 = vmatprep.mubr.msk.bf16.mxu0 %vm1710_vm1, %v1709_v7 }
  0x22   : > { %1468 = vmatmul.mubr.msk.bf16.vlgmr.msra.gmra.mxu1 %vm425_vm0, %v384_v6 }
  0x23   : > { %1479 = vmatprep.mubr.msk.bf16.mxu1 %vm1710_vm1, %v1709_v7 }
  0xe0   : > { %v463_v8 = vpop.f32.mrf.mxu0 }
  0xe1   : > { %v515_v14 = vpack.c.bf16 %v463_v8, %v463_v8 }
  0xe2   : > { %v465_v9 = vpop.f32.mrf.mxu0  ;;  %v504_v36 = vpop.f32.mrf.mxu1 }
  0xe3   : > { %v516_v10 = vpack.c.bf16 %v465_v9, %v465_v9  ;;  %v1890_v37 = vpack.c.bf16 %v504_v36, %v504_v36 }
  0xe4   : > { %v467_v11 = vpop.f32.mrf.mxu0  ;;  %v1469_v38 = vpop.f32.mrf.mxu1 }
  0xe5   : > { %743 = vrot.lane.b32.xlu1 %v516_v10, %s1711_s13  ;;  %630 = vrot.lane.b32.xlu0 %v516_v10, %s2062_s14  ;;  %v522_v12 = vsel %vm425_vm0, %v516_v10, 0  ;;  %v584_v39 = vsel %vm582_vm4, %v1890_v37, 0 }
  0xe6   : > { %v468_v13 = vpop.f32.mrf.mxu0  ;;  %1472 = vmatpush3.bf16.xpose.msra.mxu0 %v522_v12  ;;  %v507_v40 = vpop.f32.mrf.mxu1  ;;  %1478 = vmatpush3.bf16.msra.mxu1 %v584_v39 }
  0xe7   : > { %1483 = vmatprep.subr.bf16.mxu0 %v1709_v7  ;;  %1489 = vmatprep.subr.bf16.mxu1 %v1709_v7 }
  0xe8   : > { %v1470_v41 = vpop.f32.mrf.mxu1 }
  0xe9   : > { %741 = vrot.lane.b32.xlu1 %v515_v14, %s1711_s13  ;;  %627 = vrot.lane.b32.xlu0 %v515_v14, %s2062_s14 }
  0xed   : > { %853 = vrot.lane.b32.xlu1 %v515_v14, %s1713_s15  ;;  %855 = vrot.lane.b32.xlu0 %v516_v10, %s1713_s15 }
  0xee   : > { %1474 = vmatmul.mubr.msk.bf16.vlgmr.msra.gmra.mxu0 %vm425_vm0, %v515_v14 }
  0xef   : > { %1485 = vmatprep.mubr.msk.bf16.mxu0 %vm1710_vm1, %v1709_v7 }
 0x157   : > { %v631_v17 = vpop.permute.xlu0 %630  ;;  %v744_v19 = vpop.permute.xlu1 %743 }
 0x158   : > { %v636_v18 = vsel %vm425_vm0, %v631_v17, 0  ;;  %v749_v21 = vsel %vm425_vm0, %v744_v19, 0 }
 0x159   : > { %1484 = vmatpush3.bf16.xpose.msra.mxu0 %v636_v18 }
 0x15a   : > { %1495 = vmatprep.subr.bf16.mxu0 %v1709_v7 }
 0x15b   : > { %v628_v20 = vpop.permute.xlu0 %627  ;;  %v742_v23 = vpop.permute.xlu1 %741 }
 0x15f   : > { %v856_v22 = vpop.permute.xlu0 %855  ;;  %v854_v25 = vpop.permute.xlu1 %853 }
 0x160   : > { %1486 = vmatmul.mubr.msk.bf16.vlgmr.msra.gmra.mxu0 %vm425_vm0, %v628_v20  ;;  %v861_v24 = vsel %vm425_vm0, %v856_v22, 0 }
 0x161   : > { %1496 = vmatpush3.bf16.xpose.msra.mxu0 %v749_v21  ;;  %1497 = vmatprep.mubr.msk.bf16.mxu0 %vm1710_vm1, %v1709_v7 }
 0x162   : > { %1507 = vmatprep.subr.bf16.mxu0 %v1709_v7 }
 0x168   : > { %1498 = vmatmul.mubr.msk.bf16.vlgmr.msra.gmra.mxu0 %vm425_vm0, %v742_v23 }
 0x169   : > { %1508 = vmatpush3.bf16.xpose.msra.mxu0 %v861_v24  ;;  %1509 = vmatprep.mubr.msk.bf16.mxu0 %vm1710_vm1, %v1709_v7 }
 0x16a   : > { %1519 = vmatprep.subr.bf16.mxu0 %v1709_v7 }
 0x170   : > { %1510 = vmatmul.mubr.msk.bf16.vlgmr.msra.gmra.mxu0 %vm425_vm0, %v854_v25 }
 0x171   : > { %1535 = vmatprep.mubr.msk.bf16.mxu0 %vm1710_vm1, %v1709_v7 }
 0x1ae   : > { %v558_v29 = vpop.f32.mrf.mxu0 }
 0x1af   : > { %v564_v30 = vmul.f32 0.17677669, %v558_v29 }
 0x1b0   : > { %v1475_v31 = vpop.f32.mrf.mxu0 }
 0x1b1   : > { %v565_v32 = vsel %vm514_vm2, %v564_v30, -1000000.0 }
 0x1b2   : > { %v561_v33 = vpop.f32.mrf.mxu0  ;;  %v567_v34 = vsel %vm566_vm3, %v565_v32, -inf }
 0x1b3   : > { %568 = vmax.xlane.f32.xlu0 %v567_v34 }
 0x1b4   : > { %v1476_v35 = vpop.f32.mrf.mxu0 }
 0x220   : > { %v672_v42 = vpop.f32.mrf.mxu0 }
 0x221   : > { %v678_v43 = vmul.f32 0.17677669, %v672_v42 }
 0x222   : > { %v1487_v44 = vpop.f32.mrf.mxu0 }
 0x223   : > { %v679_v45 = vsel %vm514_vm2, %v678_v43, -1000000.0 }
 0x224   : > { %v675_v46 = vpop.f32.mrf.mxu0  ;;  %v680_v47 = vsel %vm566_vm3, %v679_v45, -inf }
 0x225   : > { %681 = vmax.xlane.f32.xlu1 %v680_v47  ;;  %v1612_v47 = vld [vmem:[%s2070_s2 + $0x38] sm:$0xff]  }
 0x226   : > { %v1488_v48 = vpop.f32.mrf.mxu0  ;;  %1520 = vmatpush3.bf16.msra.mxu0 %v1612_v47 }
 0x227   : > { %v1613_v48 = vld [vmem:[%s2070_s2 + $0x30] sm:$0xff]   ;;  %1521 = vmatprep.subr.bf16.mxu0 %v1709_v7 }
 0x228   : > { %v785_v49 = vpop.f32.mrf.mxu0 }
 0x229   : > { %v791_v50 = vmul.f32 0.17677669, %v785_v49  ;;  %v1614_v49 = vld [vmem:[%s2070_s2 + $0x28] sm:$0xff]  }
 0x22a   : > { %v1499_v51 = vpop.f32.mrf.mxu0  ;;  %1522 = vmatpush3.bf16.msra.mxu0 %v1613_v48 }
 0x22b   : > { %v792_v52 = vsel %vm514_vm2, %v791_v50, -1000000.0  ;;  %1523 = vmatprep.subr.bf16.mxu0 %v1709_v7  ;;  %v1615_v50 = vld [vmem:[%s2070_s2 + $0x20] sm:$0xff]   ;;  %v1616_v51 = vld [vmem:[%s2070_s2 + $0x18] sm:$0xff]  }
 0x22c   : > { %v788_v53 = vpop.f32.mrf.mxu0  ;;  %v793_v54 = vsel %vm566_vm3, %v792_v52, -inf }
 0x22d   : > { %794 = vmax.xlane.f32.xlu0 %v793_v54  ;;  %v1618_v53 = vld [vmem:[%s2070_s2 + $0x8] sm:$0xff]  }
 0x22e   : > { %v1500_v55 = vpop.f32.mrf.mxu0  ;;  %1524 = vmatpush3.bf16.msra.mxu0 %v1614_v49 }
 0x22f   : > { %1525 = vmatprep.subr.bf16.mxu0 %v1709_v7 }
 0x230   : > { %v897_v56 = vpop.f32.mrf.mxu0 }
 0x231   : > { %v903_v57 = vmul.f32 0.17677669, %v897_v56  ;;  %v1619_v56 = vld [vmem:[%s2070_s2] sm:$0xff]  }
 0x232   : > { %v1511_v58 = vpop.f32.mrf.mxu0  ;;  %1526 = vmatpush3.bf16.msra.mxu0 %v1615_v50 }
 0x233   : > { %v904_v59 = vsel %vm514_vm2, %v903_v57, -1000000.0  ;;  %1527 = vmatprep.subr.bf16.mxu0 %v1709_v7 }
 0x234   : > { %v900_v60 = vpop.f32.mrf.mxu0  ;;  %v905_v61 = vsel %vm566_vm3, %v904_v59, -inf }
 0x235   : > { %906 = vmax.xlane.f32.xlu0 %v905_v61 }
 0x236   : > { %v1512_v62 = vpop.f32.mrf.mxu0  ;;  %1528 = vmatpush3.bf16.msra.mxu0 %v1616_v51 }
 0x237   : > { %1529 = vmatprep.subr.bf16.mxu0 %v1709_v7 }
 0x23c   : > { %v569_v63 = vpop.xlane.xlu0 %568 }
 0x23d   : > { %v570_v0 = vsub.f32 %v565_v32, %v569_v63 }
 0x23f   : > { %v571_v1 = vmul.f32 1.442695, %v570_v0 }
 0x241   : > { %1626 = vpow2.f32 %v571_v1 }
 0x24e   : > { %v1627_v2 = vpop.eup %1626 }
 0x24f   : > { %v573_v3 = vsel %vm566_vm3, %v1627_v2, 0.0 }
 0x250   : > { %574 = vadd.xlane.f32.xlu1 %v573_v3 }
 0x261   : > { %693 = vrot.lane.b32.xlu1 %v1890_v37, %s2062_s14  ;;  %s2071_s14 = smov 96  }
 0x2ae   : > { %v682_v4 = vpop.xlane.xlu1 %681 }
 0x2af   : > { %v683_v6 = vsub.f32 %v679_v45, %v682_v4 }
 0x2b1   : > { %v684_v8 = vmul.f32 1.442695, %v683_v6 }
 0x2b3   : > { %1628 = vpow2.f32 %v684_v8 }
 0x2b6   : > { %v795_v9 = vpop.xlane.xlu0 %794 }
 0x2b7   : > { %v796_v10 = vsub.f32 %v792_v52, %v795_v9  ;;  %v1617_v52 = vld [vmem:[%s2070_s2 + $0x10] sm:$0xff]  }
 0x2b8   : > { %1530 = vmatpush3.bf16.msra.mxu0 %v1617_v52 }
 0x2b9   : > { %v797_v11 = vmul.f32 1.442695, %v796_v10  ;;  %1531 = vmatprep.subr.bf16.mxu0 %v1709_v7 }
 0x2bb   : > { %1630 = vpow2.f32 %v797_v11 }
 0x2bc   : > { %1532 = vmatpush3.bf16.msra.mxu0 %v1618_v53 }
 0x2bd   : > { %1533 = vmatprep.subr.bf16.mxu0 %v1709_v7 }
 0x2be   : > { %v907_v12 = vpop.xlane.xlu0 %906 }
 0x2bf   : > { %v908_v13 = vsub.f32 %v904_v59, %v907_v12 }
 0x2c0   : > { %v1629_v14 = vpop.eup %1628  ;;  %1534 = vmatpush3.bf16.msra.mxu0 %v1619_v56 }
 0x2c1   : > { %v909_v15 = vmul.f32 1.442695, %v908_v13  ;;  %v686_v16 = vsel %vm566_vm3, %v1629_v14, 0.0 }
 0x2c2   : > { %687 = vadd.xlane.f32.xlu0 %v686_v16 }
 0x2c3   : > { %1632 = vpow2.f32 %v909_v15 }
 0x2c8   : > { %v1631_v17 = vpop.eup %1630 }
 0x2c9   : > { %v799_v18 = vsel %vm566_vm3, %v1631_v17, 0.0 }
 0x2ca   : > { %800 = vadd.xlane.f32.xlu1 %v799_v18 }
 0x2d0   : > { %v1633_v19 = vpop.eup %1632 }
 0x2d1   : > { %v911_v20 = vsel %vm566_vm3, %v1633_v19, 0.0 }
 0x2d2   : > { %912 = vadd.xlane.f32.xlu0 %v911_v20  ;;  %v1620_v20 = vld [vmem:[%s2055_s5 + $0x8] sm:$0xff]  }
 0x2d9   : > { %v575_v21 = vpop.xlane.xlu1 %574 }
 0x2da   : > { %1634 = vrcp.f32 %v575_v21  ;;  %v1621_v21 = vld [vmem:[%s2055_s5] sm:$0xff]  }
 0x2db   : > { %917 = vrot.lane.b32.xlu1 %v1890_v37, %s1713_s15 }
 0x2dd   : > { %v694_v23 = vpop.permute.xlu1 %693 }
 0x2de   : > { %v699_v26 = vsel %vm582_vm4, %v694_v23, 0 }
 0x2e7   : > { %v1635_v22 = vpop.eup %1634 }
 0x2e8   : > { %805 = vrot.lane.b32.xlu0 %v1890_v37, %s1711_s13  ;;  %v577_v24 = vmul.f32 %v1635_v22, %v1627_v2 }
 0x2ea   : > { %v578_v25 = vpack.c.bf16 %v577_v24, %v577_v24 }
 0x2ec   : > { %1480 = vmatmul.mubr.msk.bf16.vlgmr.msra.gmra.mxu1 %vm566_vm3, %v578_v25 }
 0x2ed   : > { %1490 = vmatpush3.bf16.msra.mxu1 %v699_v26  ;;  %1491 = vmatprep.mubr.msk.bf16.mxu1 %vm1710_vm1, %v1709_v7 }
 0x2ee   : > { %1501 = vmatprep.subr.bf16.mxu1 %v1709_v7 }
 0x34b   : > { %v688_v27 = vpop.xlane.xlu0 %687 }
 0x34c   : > { %1636 = vrcp.f32 %v688_v27 }
 0x353   : > { %v801_v28 = vpop.xlane.xlu1 %800 }
 0x354   : > { %1638 = vrcp.f32 %v801_v28 }
 0x357   : > { %v918_v37 = vpop.permute.xlu1 %917 }
 0x358   : > { %v923_v39 = vsel %vm582_vm4, %v918_v37, 0 }
 0x359   : > { %v1637_v29 = vpop.eup %1636 }
 0x35a   : > { %v690_v30 = vmul.f32 %v1637_v29, %v1629_v14 }
 0x35b   : > { %v913_v31 = vpop.xlane.xlu0 %912 }
 0x35c   : > { %1640 = vrcp.f32 %v913_v31  ;;  %v691_v32 = vpack.c.bf16 %v690_v30, %v690_v30  ;;  %v1409_v31 = vld [vmem:[%s2053_s3] ss:$0 sm:$0xff] }
 0x35e   : > { %1492 = vmatmul.mubr.msk.bf16.vlgmr.msra.gmra.mxu1 %vm566_vm3, %v691_v32 }
 0x35f   : > { %v806_v33 = vpop.permute.xlu0 %805  ;;  %1503 = vmatprep.mubr.msk.bf16.mxu1 %vm1710_vm1, %v1709_v7 }
 0x360   : > { %v811_v34 = vsel %vm582_vm4, %v806_v33, 0  ;;  %v1410_v33 = vld [vmem:[%s2054_s4] ss:$0 sm:$0xff] }
 0x361   : > { %v1639_v35 = vpop.eup %1638  ;;  %1502 = vmatpush3.bf16.msra.mxu1 %v811_v34 }
 0x362   : > { %1513 = vmatprep.subr.bf16.mxu1 %v1709_v7  ;;  %v803_v36 = vmul.f32 %v1639_v35, %v1631_v17 }
 0x364   : > { %v804_v38 = vpack.c.bf16 %v803_v36, %v803_v36  ;;  %v1622_v36 = vld [vmem:[%s2057_s7 + $0x18] sm:$0xff]  }
 0x366   : > { %1504 = vmatmul.mubr.msk.bf16.vlgmr.msra.gmra.mxu1 %vm566_vm3, %v804_v38  ;;  %v1623_v38 = vld [vmem:[%s2057_s7 + $0x10] sm:$0xff]  }
 0x367   : > { %1514 = vmatpush3.bf16.msra.mxu1 %v923_v39  ;;  %1515 = vmatprep.mubr.msk.bf16.mxu1 %vm1710_vm1, %v1709_v7  ;;  %v1624_v39 = vld [vmem:[%s2057_s7 + $0x8] sm:$0xff]  }
 0x368   : > { %1539 = vmatprep.subr.bf16.mxu1 %v1709_v7 }
 0x369   : > { %v1641_v40 = vpop.eup %1640 }
 0x36a   : > { %v915_v41 = vmul.f32 %v1641_v40, %v1633_v19  ;;  %v1625_v40 = vld [vmem:[%s2057_s7] sm:$0xff]  }
 0x36c   : > { %v916_v42 = vpack.c.bf16 %v915_v41, %v915_v41  ;;  %v1411_v41 = vld [vmem:[%s2056_s6] ss:$0 sm:$0xff] }
 0x36e   : > { %1516 = vmatmul.mubr.msk.bf16.vlgmr.msra.gmra.mxu1 %vm566_vm3, %v916_v42 }
 0x36f   : > { %1543 = vmatprep.mubr.msk.bf16.mxu1 %vm1710_vm1, %v1709_v7  ;;  %1540 = vmatpush3.bf16.msra.mxu1 %v1620_v20 }
 0x370   : > { %1541 = vmatprep.subr.bf16.mxu1 %v1709_v7 }
 0x373   : > { %1542 = vmatpush3.bf16.msra.mxu1 %v1621_v21 }
 0x374   : > { %1547 = vmatprep.subr.bf16.mxu1 %v1709_v7 }
 0x3ac   : > { %v620_v43 = vpop.f32.mrf.mxu1 }
 0x3ae   : > { %v1481_v44 = vpop.f32.mrf.mxu1 }
 0x3b0   : > { %v623_v45 = vpop.f32.mrf.mxu1 }
 0x3b2   : > { %v1482_v46 = vpop.f32.mrf.mxu1 }
 0x41e   : > { %v735_v54 = vpop.f32.mrf.mxu1 }
 0x41f   : > { %966 = vrot.lane.b32.xlu1 %v735_v54, %s1713_s15 }
 0x420   : > { %v1493_v55 = vpop.f32.mrf.mxu1 }
 0x422   : > { %v738_v57 = vpop.f32.mrf.mxu1 }
 0x424   : > { %v1494_v58 = vpop.f32.mrf.mxu1 }
 0x426   : > { %v847_v59 = vpop.f32.mrf.mxu1 }
 0x427   : > { %970 = vrot.lane.b32.xlu0 %v847_v59, %s1711_s13  ;;  %s375_s13 = sand.u32 1, %s1698_s18  }
 0x428   : > { %v1505_v60 = vpop.f32.mrf.mxu1  ;;  %s1383_s15 = sshll.u32 %s375_s13, 3  ;;  %s1307_s2 = scalar_lea.sflag [#allocation3], %s375_s13 }
 0x429   : > { %s377_s25 = scalar_lea.vmem [#allocation2], %s1383_s15 }
 0x42a   : > { %v850_v61 = vpop.f32.mrf.mxu1  ;;  %s1320_s29 = sshll.u32 %s377_s25, 4  ;;  %s1321_s29 = int_to_ptr.vmem [resolvable:$true] %s1320_s29 }
 0x42b   : > { %s1646_s30 = scalar_lea.vmem %s1321_s29, 128  ;;  %p1653_p0 = scmp.lt.s32.totalorder %s1321_s29, %s1651_s16 }
 0x42c   : > { %v1506_v62 = vpop.f32.mrf.mxu1  ;;  %p1647_p11 = scmp.ne.s32.totalorder %s1321_s29, %s1646_s30  ;;  %p1654_p1 = scmp.lt.s32.totalorder %s1652_s21, %s1646_s30 }
 0x42e   : > { %v959_v63 = vpop.f32.mrf.mxu1  ;;  %p1648_p12 = pnand %p1647_p11, %p1813_p5  ;;  %p1655_p2 = por %p1654_p1, %p1653_p0 }
 0x42f   : > { %974 = vrot.lane.b32.xlu1 %v959_v63, %s2071_s14 }
 0x430   : > { %v1517_v0 = vpop.f32.mrf.mxu1  ;;  %p1649_p13 = pneg %p1648_p12 }
 0x432   : > { %v962_v1 = vpop.f32.mrf.mxu1  ;;  %p1656_p3 = pnand %p1655_p2, %p1649_p13 }
 0x434   : > { %v1518_v2 = vpop.f32.mrf.mxu1 }
 0x491   : > { %v967_v3 = vpop.permute.xlu1 %966 }
 0x492   : > { %v977_v6 = vsel %vm425_vm0, %v620_v43, %v967_v3 }
 0x499   : > { %v971_v4 = vpop.permute.xlu0 %970 }
 0x49a   : > { %v979_v8 = vsel %vm978_vm5, %v977_v6, %v971_v4  ;;  %v1421_v4 = vld [vmem:[%s2059_s9] ss:$0 sm:$0xff] }
 0x4a1   : > { %v975_v9 = vpop.permute.xlu1 %974 }
 0x4a2   : > { %v981_v10 = vsel %vm980_vm6, %v979_v8, %v975_v9  ;;  %v1422_v8 = vld [vmem:[%s2060_s10] ss:$0 sm:$0xff] }
 0x4a3   : > { %v982_v11 = vpack.c.bf16 %v981_v10, %v981_v10 }
 0x4a5   : > { %1536 = vmatmul.mubr.bf16.vlgmr.msra.gmra.mxu0 %v982_v11 }
 0x565   : > { %v1081_v12 = vpop.f32.mrf.mxu0 }
 0x566   : > { %v1087_v13 = vadd.f32 %v1081_v12, %v1840_v5 }
 0x567   : > { %v1537_v14 = vpop.f32.mrf.mxu0 }
 0x568   : > { %v1090_v15 = vsel %vm425_vm0, %v1087_v13, 0.0  ;;  %v1095_v16 = vmul.f32 %v1087_v13, %v1087_v13 }
 0x569   : > { %1091 = vadd.xlane.f32.xlu0 %v1090_v15  ;;  %v1084_v17 = vpop.f32.mrf.mxu0 }
 0x56a   : > { %v1096_v18 = vsel %vm425_vm0, %v1095_v16, 0.0 }
 0x56b   : > { %1097 = vadd.xlane.f32.xlu1 %v1096_v18  ;;  %v1538_v19 = vpop.f32.mrf.mxu0 }
 0x5f2   : > { %v1092_v5 = vpop.xlane.xlu0 %1091 }
 0x5f3   : > { %v1094_v22 = vmul.f32 0.03125, %v1092_v5 }
 0x5f4   : > { %v1098_v23 = vpop.xlane.xlu1 %1097 }
 0x5f5   : > { %v1100_v24 = vmul.f32 %v1094_v22, %v1094_v22  ;;  %v1099_v25 = vmul.f32 0.03125, %v1098_v23  ;;  %v1103_v29 = vsub.f32 %v1087_v13, %v1094_v22 }
 0x5f7   : > { %v1101_v26 = vsub.f32 %v1099_v25, %v1100_v24 }
 0x5f9   : > { %v1102_v27 = vmax.f32 %v1101_v26, 0.0 }
 0x5fb   : > { %v1104_v28 = vadd.f32 1e-05, %v1102_v27 }
 0x5fd   : > { %1642 = vrsqrt.f32 %v1104_v28 }
 0x60a   : > { %v1643_v30 = vpop.eup %1642 }
 0x60b   : > { %v1106_v32 = vmul.f32 %v1643_v30, %v1103_v29 }
 0x60d   : > { %v1113_v34 = vmul.f32 %v1409_v31, %v1106_v32 }
 0x60f   : > { %v1120_v35 = vadd.f32 %v1410_v33, %v1113_v34 }
 0x611   : > { %v1121_v37 = vpack.c.bf16 %v1120_v35, %v1120_v35 }
 0x613   : > { %1544 = vmatmul.mubr.msk.bf16.vlgmr.msra.gmra.mxu1 %vm425_vm0, %v1121_v37 }
 0x614   : > { %1548 = vmatpush3.bf16.msra.mxu1 %v1622_v36  ;;  %1555 = vmatprep.mubr.msk.bf16.mxu1 %vm1710_vm1, %v1709_v7 }
 0x615   : > { %1549 = vmatprep.subr.bf16.mxu1 %v1709_v7 }
 0x618   : > { %1550 = vmatpush3.bf16.msra.mxu1 %v1623_v38 }
 0x619   : > { %1551 = vmatprep.subr.bf16.mxu1 %v1709_v7 }
 0x61c   : > { %1552 = vmatpush3.bf16.msra.mxu1 %v1624_v39 }
 0x61d   : > { %1553 = vmatprep.subr.bf16.mxu1 %v1709_v7  ;;  %v1415_v7 = vld [vmem:[%s2058_s8] ss:$0 sm:$0xff] }
 0x620   : > { %1554 = vmatpush3.bf16.msra.mxu1 %v1625_v40 }
 0x6d3   : > { %v1182_v42 = vpop.f32.mrf.mxu1 }
 0x6d4   : > { %v1183_v43 = vadd.f32 %v1411_v41, %v1182_v42 }
 0x6d5   : > { %v1545_v44 = vpop.f32.mrf.mxu1 }
 0x6d6   : > { %v1188_v45 = vmax.f32 %v1183_v43, 0.0 }
 0x6d7   : > { %v1185_v46 = vpop.f32.mrf.mxu1 }
 0x6d8   : > { %v1189_v47 = vpack.c.bf16 %v1188_v45, %v1188_v45 }
 0x6d9   : > { %v1546_v48 = vpop.f32.mrf.mxu1 }
 0x6da   : > { %1556 = vmatmul.mubr.msk.bf16.vlgmr.msra.gmra.mxu1 %vm978_vm5, %v1189_v47 }
 0x79a   : > { %v1266_v49 = vpop.f32.mrf.mxu1 }
 0x79b   : > { %v1267_v50 = vadd.f32 %v1415_v7, %v1266_v49 }
 0x79c   : > { %v1557_v51 = vpop.f32.mrf.mxu1 }
 0x79d   : > { %v1272_v52 = vadd.f32 %v1267_v50, %v1120_v35 }
 0x79e   : > { %v1269_v53 = vpop.f32.mrf.mxu1 }
 0x79f   : > { %v1275_v54 = vsel %vm425_vm0, %v1272_v52, 0.0  ;;  %v1279_v55 = vmul.f32 %v1272_v52, %v1272_v52 }
 0x7a0   : > { %1276 = vadd.xlane.f32.xlu0 %v1275_v54  ;;  %v1558_v56 = vpop.f32.mrf.mxu1 }
 0x7a1   : > { %v1280_v57 = vsel %vm425_vm0, %v1279_v55, 0.0 }
 0x7a4   : > { %1281 = vadd.xlane.f32.xlu0 %v1280_v57 }
 0x829   : > { %v1277_v58 = vpop.xlane.xlu0 %1276 }
 0x82a   : > { %v1278_v59 = vmul.f32 0.03125, %v1277_v58 }
 0x82c   : > { %v1284_v61 = vmul.f32 %v1278_v59, %v1278_v59  ;;  %v1287_v2 = vsub.f32 %v1272_v52, %v1278_v59 }
 0x82d   : > { %v1282_v60 = vpop.xlane.xlu0 %1281 }
 0x82e   : > { %v1283_v62 = vmul.f32 0.03125, %v1282_v60 }
 0x830   : > { %v1285_v63 = vsub.f32 %v1283_v62, %v1284_v61 }
 0x832   : > { %v1286_v0 = vmax.f32 %v1285_v63, 0.0 }
 0x834   : > { %v1288_v1 = vadd.f32 1e-05, %v1286_v0 }
 0x836   : > { %1644 = vrsqrt.f32 %v1288_v1 }
 0x843   : > { %v1645_v3 = vpop.eup %1644 }
 0x844   : > { %v1290_v6 = vmul.f32 %v1645_v3, %v1287_v2 }
 0x846   : > { %v1297_v9 = vmul.f32 %v1421_v4, %v1290_v6 }
 0x848   : > { %v1304_v10 = vadd.f32 %v1422_v8, %v1297_v9 }
 0x84a   : > { %1305 = vst.msk [vmem:[%s377_s25] sm:$0xff] %vm425_vm0, %v1304_v10 }
 0x84b   : > { %1659 = shalt.err (!%p1656_p3)
}
 0x84c   : > { %s1660_s0 = scalar_lea.hbm %s1318_s1, 128  ;;  %s1664_s22 = scalar_lea.hbm %s2061_s11, 256 }
 0x84d   : > { %p1661_p4 = scmp.ne.s32.totalorder %s1318_s1, %s1660_s0  ;;  %p1665_p9 = scmp.lt.s32.totalorder %s1318_s1, %s2061_s11 }
 0x84e   : > { %p1666_p10 = scmp.lt.s32.totalorder %s1664_s22, %s1660_s0 }
 0x84f   : > { %p1662_p7 = pnand %p1661_p4, %p1813_p5 }
 0x850   : > { %p1667_p11 = por %p1666_p10, %p1665_p9 }
 0x851   : > { %p1663_p8 = pneg %p1662_p7 }
 0x853   : > { %p1668_p12 = pnand %p1667_p11, %p1663_p8 }
 0x855   : > { %1671 = shalt.err (!%p1668_p12)
}
 0x856   : > { %1559 = dma.vmem_to_hbm [thread:$0]  (%p1813_p5), %s1321_s29, 128, %s1318_s1, %s1307_s2  }
 0x857 PF: > { %p1565_p13 = scmp.ge.s32.totalorder %s1706_s20, 2  ;;  %s1332_s14 = sand.u32 1, %s1694_s17  }
 0x858   : > { %s1333_s30 = scalar_lea.sflag [#allocation3], %s1332_s14 }
 0x859   : > { %p1562_p0 = pnand %p1565_p13, %p1817_p6 }
 0x85b   : > { %p1563_p1 = pneg %p1562_p0 }
 0x85d   : > { %1689 = dma.done.wait (%p1563_p1), %s1333_s30, 128  }
 0x85e   : > { %1691 = vsyncadd (%p1563_p1), %s1333_s30, 4294967168  ;;  %p21_p2 = scmp.ge.s32.totalorder %s1800_s23, 4   ;;  %s2072_s17 = smov %s1698_s18 }
 0x85f   : > { %s2073_s18 = smov %s1702_s19  ;;  %s2074_s19 = smov %s1811_s26 }
 0x860   : > { %s2075_s20 = smov %s1800_s23  ;;  %23 = sbr.rel (!%p21_p2) target bundleno = 7 (0x7), region = 99 }
 0x865   :  { %1338 = vsyncpa [#allocation3], 1 }
 0x866   :  { %1340 = vsyncpa [#allocation3 + $0x1], 1 }

</bundles_post_ra>
